<compile_context>
chip_gen: v7x
topology: tpu7x:2x2x1
jax: 0.10.0
libtpu: 0.0.40
codegen_flags: <defaults>
</compile_context>

<pallas_src>
import functools
import math
from typing import NamedTuple

import jax
import jax.numpy as jnp
from jax.experimental import pallas as pl
from jax.experimental.pallas import tpu as pltpu


def _round_up(v, m):
    return (v + m - 1) // m * m


def _vmem_capacity_bytes():
    try:
        return int(pltpu.get_tpu_info().vmem_capacity_bytes)
    except Exception:
        return 64 << 20  # conservative (v7x per-TC VMEM)


def _footprint(tm, tf, d_pad, isz):
    """Approximate VMEM bytes for one grid step (double-buffered pipeline)."""
    x_out = 2 * 2 * tm * d_pad * isz              # x + out tiles, 2 buffers each
    w = 2 * d_pad * (2 * tf) * isz                # fused [Wg|W1] tile, 2 buffers
    w += 2 * tf * d_pad * isz                     # W2 tile, 2 buffers
    acc = tm * d_pad * 4                          # f32 accumulator scratch
    inter = tm * tf * (8 + 4 + 2 * isz)           # f32 gh + f32 act + g/a temps
    return x_out + w + acc + inter


class GLUParams(NamedTuple):
    w_gh: jax.Array      # (F_pad // tf, D_pad, 2*tf): per F tile [gate | fc1]
    w2: jax.Array        # (F_pad, D_pad)
    d: int
    f: int
    d_pad: int
    f_pad: int
    tf: int
    vmem_budget: int
    vmem_cap: int


def prepare_glu_weights(w_gate, w_fc1, w_fc2):
    """One-time weight layout (hoisted out of the per-call path).

    w_gate : [F, D]   (nn.Linear layout: [out_features, in_features])
    w_fc1  : [F, D]
    w_fc2  : [D, F]
    """
    w_gate = jnp.asarray(w_gate)
    w_fc1 = jnp.asarray(w_fc1)
    w_fc2 = jnp.asarray(w_fc2)
    f, d = w_gate.shape
    assert w_fc1.shape == (f, d) and w_fc2.shape == (d, f)

    d_pad = _round_up(d, 128)
    # Prefer 256-aligned contraction/output dim (2x256x256 MXU on v6e/v7x)
    # when the extra padding is small.
    if d_pad % 256 != 0 and d_pad + 128 <= int(d * 1.07):
        d_pad += 128

    vmem_cap = _vmem_capacity_bytes()
    budget = (vmem_cap * 3) // 4                  # ~96 MiB on 128 MiB, ~48 on 64
    isz = jnp.dtype(w_gate.dtype).itemsize
    target_tm = 1024 if vmem_cap >= (96 << 20) else 512

    tf_cands = [t for t in (512, 256, 128) if t <= _round_up(f, 128)]
    if not tf_cands:
        tf_cands = [_round_up(f, 128)]
    tf = tf_cands[-1]
    for t in tf_cands:
        if _footprint(target_tm, t, d_pad, isz) <= budget:
            tf = t
            break
    f_pad = _round_up(f, tf)
    nf = f_pad // tf

    # Pad + transpose to math layout (zero rows/cols contribute exactly zero).
    wg_t = jnp.pad(w_gate.T, ((0, d_pad - d), (0, f_pad - f)))   # (Dp, Fp)
    w1_t = jnp.pad(w_fc1.T, ((0, d_pad - d), (0, f_pad - f)))    # (Dp, Fp)
    w2_t = jnp.pad(w_fc2.T, ((0, f_pad - f), (0, d_pad - d)))    # (Fp, Dp)

    # Interleave gate / fc1 per F tile so the kernel issues one MXU pass.
    wg_r = wg_t.reshape(d_pad, nf, tf)
    w1_r = w1_t.reshape(d_pad, nf, tf)
    w_gh = jnp.concatenate([wg_r, w1_r], axis=-1).transpose(1, 0, 2)  # (nf,Dp,2tf)

    return GLUParams(w_gh=w_gh, w2=w2_t, d=d, f=f, d_pad=d_pad, f_pad=f_pad,
                     tf=tf, vmem_budget=int(budget), vmem_cap=int(vmem_cap))


def _glu_kernel(x_ref, wgh_ref, w2_ref, o_ref, acc_ref):
    # x_ref: (tm, Dp)  wgh_ref: (1, Dp, 2*tf)  w2_ref: (tf, Dp)
    # o_ref: (tm, Dp)  acc_ref: (tm, Dp) f32, resident across the F (j) axis.
    j = pl.program_id(1)

    @pl.when(j == 0)
    def _init():
        acc_ref[...] = jnp.zeros_like(acc_ref)

    tf = w2_ref.shape[0]
    x = x_ref[...]
    # Single MXU pass over x for both the gate and fc1 projections.
    gh = jnp.dot(x, wgh_ref[0], preferred_element_type=jnp.float32)  # (tm, 2tf)
    g = gh[:, :tf].astype(x_ref.dtype)     # gate(x) in activation dtype
    h = gh[:, tf:].astype(x_ref.dtype)     # fc1(x)  in activation dtype
    # Torch: silu(h.float()).type_as(h) * g   (elementwise in activation dtype)
    hf = h.astype(jnp.float32)
    a = (hf * jax.nn.sigmoid(hf)).astype(x_ref.dtype) * g
    acc_ref[...] += jnp.dot(a, w2_ref[...], preferred_element_type=jnp.float32)

    @pl.when(j == pl.num_programs(1) - 1)
    def _finalize():
        o_ref[...] = acc_ref[...].astype(o_ref.dtype)


@functools.partial(jax.jit,
                   static_argnames=("d", "d_pad", "f_pad", "tf", "tm",
                                    "vmem_limit"))
def _glu_pallas(x, w_gh, w2_t, *, d, d_pad, f_pad, tf, tm, vmem_limit):
    x_shape = x.shape
    x2 = x.reshape(-1, d)
    m = x2.shape[0]
    m_pad = _round_up(m, tm)
    x_p = jnp.pad(x2, ((0, m_pad - m), (0, d_pad - d)))

    grid = (m_pad // tm, f_pad // tf)
    isz = jnp.dtype(x.dtype).itemsize
    cost = pl.CostEstimate(
        flops=6 * m_pad * d_pad * f_pad,
        transcendentals=m_pad * f_pad,
        bytes_accessed=(2 * m_pad * d_pad * isz            # x read + y write
                        + grid[0] * 3 * d_pad * f_pad * isz),  # weights / M tile
    )

    out = pl.pallas_call(
        _glu_kernel,
        out_shape=jax.ShapeDtypeStruct((m_pad, d_pad), x.dtype),
        grid_spec=pltpu.PrefetchScalarGridSpec(
            num_scalar_prefetch=0,
            grid=grid,
            in_specs=[
                pl.BlockSpec((tm, d_pad), lambda i, j: (i, 0)),        # x tile
                pl.BlockSpec((1, d_pad, 2 * tf), lambda i, j: (j, 0, 0)),  # [Wg|W1]
                pl.BlockSpec((tf, d_pad), lambda i, j: (j, 0)),        # W2 tile
            ],
            out_specs=pl.BlockSpec((tm, d_pad), lambda i, j: (i, 0)),
            scratch_shapes=[pltpu.VMEM((tm, d_pad), jnp.float32)],
        ),
        compiler_params=pltpu.CompilerParams(
            dimension_semantics=("parallel", "arbitrary"),
            vmem_limit_bytes=int(vmem_limit),
        ),
        cost_estimate=cost,
    )(x_p, w_gh, w2_t)

    return out[:m, :d].reshape(x_shape)


def glu_forward(x, params: GLUParams):
    """GLU forward with pre-prepared weights (see prepare_glu_weights)."""
    m = math.prod(x.shape[:-1]) if x.ndim > 1 else 1
    isz = jnp.dtype(x.dtype).itemsize
    m_cap = _round_up(max(m, 1), 128)

    # Pick the largest M tile that fits the generation's VMEM budget (weights
    # are re-streamed once per M tile, so bigger tm => higher arithmetic
    # intensity: ~tm flops per weight byte).
    cands = [t for t in (1024, 512, 256, 128) if t <= m_cap] or [128]
    tm = cands[-1]
    for t in cands:
        if _footprint(t, params.tf, params.d_pad, isz) <= params.vmem_budget:
            tm = t
            break
    # Shrink tm if it would zero-pad M by more than half a tile of wasted work.
    while tm > 128:
        pad = _round_up(m, tm) - m
        if pad >= tm // 2 and _round_up(m, tm // 2) < _round_up(m, tm):
            tm //= 2
        else:
            break

    foot = _footprint(tm, params.tf, params.d_pad, isz)
    vmem_limit = int(min(max(foot + (6 << 20), 16 << 20),
                         params.vmem_cap - (2 << 20)))

    return _glu_pallas(x, params.w_gh, params.w2,
                       d=params.d, d_pad=params.d_pad, f_pad=params.f_pad,
                       tf=params.tf, tm=tm, vmem_limit=vmem_limit)


def _reference(x, w_gate, w_fc1, w_fc2):
    x2 = x.reshape(-1, x.shape[-1])
    g = x2 @ w_gate.T
    h = x2 @ w_fc1.T
    a = jax.nn.silu(h.astype(jnp.float32)).astype(h.dtype) * g
    y = a @ w_fc2.T
    return y.reshape(x.shape)


if __name__ == "__main__":
    key = jax.random.PRNGKey(0)
    k_x, k_g, k_1, k_2 = jax.random.split(key, 4)

    B, N = 2, 64            # batch, tokens -> M = 128
    embed_dim = 32
    ffn_dim = 64

    x = jax.random.normal(k_x, (B, N, embed_dim), dtype=jnp.float32)

    # nn.Linear weights are [out_features, in_features]; deterministic init.
    bound_in = 1.0 / (embed_dim ** 0.5)
    bound_ffn = 1.0 / (ffn_dim ** 0.5)
    w_gate = jax.random.uniform(k_g, (ffn_dim, embed_dim), jnp.float32,
                                -bound_in, bound_in)
    w_fc1 = jax.random.uniform(k_1, (ffn_dim, embed_dim), jnp.float32,
                               -bound_in, bound_in)
    w_fc2 = jax.random.uniform(k_2, (embed_dim, ffn_dim), jnp.float32,
                               -bound_ffn, bound_ffn)

    params = prepare_glu_weights(w_gate, w_fc1, w_fc2)   # one-time layout
    y = glu_forward(x, params)
    jax.block_until_ready(y)

    y_ref = _reference(x, w_gate, w_fc1, w_fc2)
    assert y.shape == x.shape
    assert jnp.allclose(y, y_ref, atol=5e-5, rtol=5e-5), "mismatch vs reference"

    print("KERNEL_OK")
</pallas_src>

<mosaic_0001>
module attributes {stable_mosaic.version = 11 : i64} {
  func.func @_glu_kernel(%arg0: i32, %arg1: i32, %arg2: memref<128x128xf32, #tpu.memory_space<vmem>>, %arg3: memref<1x128x256xf32, #tpu.memory_space<vmem>>, %arg4: memref<128x128xf32, #tpu.memory_space<vmem>>, %arg5: memref<128x128xf32, #tpu.memory_space<vmem>>, %arg6: memref<128x128xf32, #tpu.memory_space<vmem>>) attributes {dimension_semantics = [#tpu.dimension_semantics<parallel>, #tpu.dimension_semantics<arbitrary>], iteration_bounds = array<i64: 1, 1>, scalar_prefetch = 0 : i64, scratch_operands = 1 : i64, tpu.core_type = #tpu.core_type<tc>, window_params = [{transform_indices = @transform_0, window_bounds = array<i64: 128, 128>}, {transform_indices = @transform_1, window_bounds = array<i64: 1, 128, 256>}, {transform_indices = @transform_2, window_bounds = array<i64: 128, 128>}, {transform_indices = @transform_3, window_bounds = array<i64: 128, 128>}]} {
    %c0_i32 = arith.constant 0 : i32
    %0 = arith.cmpi eq, %arg1, %c0_i32 : i32
    %1 = arith.extui %0 : i1 to i32
    %c0_i32_0 = arith.constant 0 : i32
    %2 = arith.cmpi ne, %1, %c0_i32_0 : i32
    scf.if %2 {
      %cst_15 = arith.constant 0.000000e+00 : f32
      %24 = vector.broadcast %cst_15 : f32 to vector<128x128xf32>
      %c0_16 = arith.constant 0 : index
      %c0_17 = arith.constant 0 : index
      %25 = vector.load %arg6[%c0_16, %c0_17] : memref<128x128xf32, #tpu.memory_space<vmem>>, vector<128x128xf32>
      tpu.vector_store %arg6[%c0_16, %c0_17], %24 {strides = array<i32>} : memref<128x128xf32, #tpu.memory_space<vmem>>, vector<128x128xf32>,
    } else {
    }
    %c0 = arith.constant 0 : index
    %c0_1 = arith.constant 0 : index
    %3 = vector.load %arg2[%c0, %c0_1] : memref<128x128xf32, #tpu.memory_space<vmem>>, vector<128x128xf32>
    %c0_2 = arith.constant 0 : index
    %c0_3 = arith.constant 0 : index
    %c0_4 = arith.constant 0 : index
    %4 = vector.load %arg3[%c0_2, %c0_3, %c0_4] : memref<1x128x256xf32, #tpu.memory_space<vmem>>, vector<1x128x256xf32>
    %5 = vector.shape_cast %4 : vector<1x128x256xf32> to vector<128x256xf32>
    %cst = arith.constant dense<0.000000e+00> : vector<128x256xf32>
    %6 = tpu.matmul %3, %5, %cst {dimension_numbers = #tpu.dot_dimension_numbers<[1], [0], [0], [1], [0, 0, 1, 1], [], []>} : vector<128x128xf32>, vector<128x256xf32>, vector<128x256xf32> -> vector<128x256xf32>
    %7 = vector.extract_strided_slice %6 {offsets = [0, 0], sizes = [128, 128], strides = [1, 1]} : vector<128x256xf32> to vector<128x128xf32>
    %8 = vector.extract_strided_slice %6 {offsets = [0, 128], sizes = [128, 128], strides = [1, 1]} : vector<128x256xf32> to vector<128x128xf32>
    %9 = arith.negf %8 : vector<128x128xf32>
    %10 = math.exp %9 : vector<128x128xf32>
    %cst_5 = arith.constant 1.000000e+00 : f32
    %11 = vector.broadcast %cst_5 : f32 to vector<128x128xf32>
    %12 = arith.addf %11, %10 : vector<128x128xf32>
    %13 = arith.divf %11, %12 : vector<128x128xf32>
    %14 = arith.mulf %8, %13 : vector<128x128xf32>
    %15 = arith.mulf %14, %7 : vector<128x128xf32>
    %c0_6 = arith.constant 0 : index
    %c0_7 = arith.constant 0 : index
    %16 = vector.load %arg6[%c0_6, %c0_7] : memref<128x128xf32, #tpu.memory_space<vmem>>, vector<128x128xf32>
    %c0_8 = arith.constant 0 : index
    %c0_9 = arith.constant 0 : index
    %17 = vector.load %arg4[%c0_8, %c0_9] : memref<128x128xf32, #tpu.memory_space<vmem>>, vector<128x128xf32>
    %cst_10 = arith.constant dense<0.000000e+00> : vector<128x128xf32>
    %18 = tpu.matmul %15, %17, %cst_10 {dimension_numbers = #tpu.dot_dimension_numbers<[1], [0], [0], [1], [0, 0, 1, 1], [], []>} : vector<128x128xf32>, vector<128x128xf32>, vector<128x128xf32> -> vector<128x128xf32>
    %19 = arith.addf %16, %18 : vector<128x128xf32>
    %c0_11 = arith.constant 0 : index
    %c0_12 = arith.constant 0 : index
    %20 = vector.load %arg6[%c0_11, %c0_12] : memref<128x128xf32, #tpu.memory_space<vmem>>, vector<128x128xf32>
    tpu.vector_store %arg6[%c0_11, %c0_12], %19 {strides = array<i32>} : memref<128x128xf32, #tpu.memory_space<vmem>>, vector<128x128xf32>,
    %c0_i32_13 = arith.constant 0 : i32
    %21 = arith.cmpi eq, %arg1, %c0_i32_13 : i32
    %22 = arith.extui %21 : i1 to i32
    %c0_i32_14 = arith.constant 0 : i32
    %23 = arith.cmpi ne, %22, %c0_i32_14 : i32
    scf.if %23 {
      %c0_15 = arith.constant 0 : index
      %c0_16 = arith.constant 0 : index
      %24 = vector.load %arg6[%c0_15, %c0_16] : memref<128x128xf32, #tpu.memory_space<vmem>>, vector<128x128xf32>
      %c0_17 = arith.constant 0 : index
      %c0_18 = arith.constant 0 : index
      %25 = vector.load %arg5[%c0_17, %c0_18] : memref<128x128xf32, #tpu.memory_space<vmem>>, vector<128x128xf32>
      tpu.vector_store %arg5[%c0_17, %c0_18], %24 {strides = array<i32>} : memref<128x128xf32, #tpu.memory_space<vmem>>, vector<128x128xf32>,
    } else {
    }
    return
  }
  func.func @transform_0(%arg0: i32, %arg1: i32) -> (i32, i32) {
    %c0_i32 = arith.constant 0 : i32
    %c0_i32_0 = arith.constant 0 : i32
    return %arg0, %c0_i32 : i32, i32
  }
  func.func @transform_1(%arg0: i32, %arg1: i32) -> (i32, i32, i32) {
    %c0_i32 = arith.constant 0 : i32
    %c0_i32_0 = arith.constant 0 : i32
    %c0_i32_1 = arith.constant 0 : i32
    return %arg1, %c0_i32, %c0_i32_0 : i32, i32, i32
  }
  func.func @transform_2(%arg0: i32, %arg1: i32) -> (i32, i32) {
    %c0_i32 = arith.constant 0 : i32
    %c0_i32_0 = arith.constant 0 : i32
    return %arg1, %c0_i32 : i32, i32
  }
  func.func @transform_3(%arg0: i32, %arg1: i32) -> (i32, i32) {
    %c0_i32 = arith.constant 0 : i32
    %c0_i32_0 = arith.constant 0 : i32
    return %arg0, %c0_i32 : i32, i32
  }
}

</mosaic_0001>

<bundles_post_ra>
// kernel: _glu_pallas.1
= control target key start
LH: loop header
LB: loop body
LE: loop exit
PB: predicated region body
PF: predicated region fallthrough
CT: control target
= control target key end

     0   :  { %v852_v3 = vmov 0.0   ;;  %s1187_s1 = inlined_call_operand.vmem [shape: f32[1,128,256], index: 1, kind: input, shape index: {}]   ;;  %s1188_s0 = inlined_call_operand.vmem [shape: f32[128,128], index: 0, kind: input, shape index: {}]   ;;  %s1189_s2 = inlined_call_operand.vmem [shape: f32[128,128], index: 2, kind: input, shape index: {}]   ;;  %s1190_s3 = inlined_call_operand.vmem [shape: f32[128,128], index: 3, kind: output, shape index: {}]  }
   0x1   :  { %v51_v0 = vld [vmem:[%s1187_s1 + $0x8] sm:$0xff]  ;;  %v53_v1 = vld [vmem:[%s1187_s1 + $0x18] sm:$0xff]  ;;  %v50_v2 = vld [vmem:[%s1187_s1] sm:$0xff]  ;;  %146 = vmatprep.mubr.f32.mxu0 %v852_v3 }
   0x2   :  { %v723_v4 = vpack.c.bf16 %v53_v1, %v51_v0  ;;  %v52_v5 = vld [vmem:[%s1187_s1 + $0x10] sm:$0xff]  ;;  %v55_v6 = vld [vmem:[%s1187_s1 + $0x28] sm:$0xff]  ;;  %v57_v7 = vld [vmem:[%s1187_s1 + $0x38] sm:$0xff] }
   0x3   :  { %v725_v8 = vpack.c.bf16 %v52_v5, %v50_v2  ;;  %v727_v9 = vpack.c.bf16 %v57_v7, %v55_v6  ;;  %v54_v10 = vld [vmem:[%s1187_s1 + $0x20] sm:$0xff]  ;;  %v56_v11 = vld [vmem:[%s1187_s1 + $0x30] sm:$0xff]  ;;  %v59_v12 = vld [vmem:[%s1187_s1 + $0x48] sm:$0xff] }
   0x4   :  { %724 = vmatprep.subr.bf16.mxu0 %v723_v4  ;;  %v61_v13 = vld [vmem:[%s1187_s1 + $0x58] sm:$0xff]  ;;  %v729_v14 = vpack.c.bf16 %v56_v11, %v54_v10  ;;  %v58_v16 = vld [vmem:[%s1187_s1 + $0x40] sm:$0xff]  ;;  %v60_v17 = vld [vmem:[%s1187_s1 + $0x50] sm:$0xff] }
   0x5   :  { %726 = vmatpush1.bf16.msra.mxu0 %v725_v8  ;;  %v731_v15 = vpack.c.bf16 %v61_v13, %v59_v12  ;;  %v63_v18 = vld [vmem:[%s1187_s1 + $0x68] sm:$0xff]  ;;  %v65_v19 = vld [vmem:[%s1187_s1 + $0x78] sm:$0xff]  ;;  %v733_v20 = vpack.c.bf16 %v60_v17, %v58_v16  ;;  %v62_v22 = vld [vmem:[%s1187_s1 + $0x60] sm:$0xff] }
   0x6   :  { %728 = vmatprep.subr.bf16.mxu0 %v727_v9  ;;  %v735_v21 = vpack.c.bf16 %v65_v19, %v63_v18  ;;  %v64_v23 = vld [vmem:[%s1187_s1 + $0x70] sm:$0xff]  ;;  %v67_v24 = vld [vmem:[%s1187_s1 + $0x88] sm:$0xff]  ;;  %v69_v25 = vld [vmem:[%s1187_s1 + $0x98] sm:$0xff] }
   0x7   :  { %v737_v26 = vpack.c.bf16 %v64_v23, %v62_v22  ;;  %v739_v27 = vpack.c.bf16 %v69_v25, %v67_v24  ;;  %v66_v28 = vld [vmem:[%s1187_s1 + $0x80] sm:$0xff]  ;;  %v68_v29 = vld [vmem:[%s1187_s1 + $0x90] sm:$0xff]  ;;  %v71_v30 = vld [vmem:[%s1187_s1 + $0xa8] sm:$0xff] }
   0x8   :  { %v73_v31 = vld [vmem:[%s1187_s1 + $0xb8] sm:$0xff]  ;;  %v741_v32 = vpack.c.bf16 %v68_v29, %v66_v28  ;;  %v70_v34 = vld [vmem:[%s1187_s1 + $0xa0] sm:$0xff]  ;;  %v72_v35 = vld [vmem:[%s1187_s1 + $0xb0] sm:$0xff] }
   0x9   :  { %730 = vmatpush1.bf16.msra.mxu0 %v729_v14  ;;  %v743_v33 = vpack.c.bf16 %v73_v31, %v71_v30  ;;  %v75_v36 = vld [vmem:[%s1187_s1 + $0xc8] sm:$0xff]  ;;  %v77_v37 = vld [vmem:[%s1187_s1 + $0xd8] sm:$0xff]  ;;  %v745_v38 = vpack.c.bf16 %v72_v35, %v70_v34  ;;  %v74_v40 = vld [vmem:[%s1187_s1 + $0xc0] sm:$0xff] }
   0xa   :  { %732 = vmatprep.subr.bf16.mxu0 %v731_v15  ;;  %v747_v39 = vpack.c.bf16 %v77_v37, %v75_v36  ;;  %v76_v41 = vld [vmem:[%s1187_s1 + $0xd0] sm:$0xff]  ;;  %v79_v42 = vld [vmem:[%s1187_s1 + $0xe8] sm:$0xff]  ;;  %v81_v43 = vld [vmem:[%s1187_s1 + $0xf8] sm:$0xff] }
   0xb   :  { %v749_v44 = vpack.c.bf16 %v76_v41, %v74_v40  ;;  %v751_v45 = vpack.c.bf16 %v81_v43, %v79_v42  ;;  %v78_v46 = vld [vmem:[%s1187_s1 + $0xe0] sm:$0xff]  ;;  %v80_v47 = vld [vmem:[%s1187_s1 + $0xf0] sm:$0xff]  ;;  %v35_v50 = vld [vmem:[%s1188_s0 + $0x8] sm:$0xff] }
   0xc   :  { %v753_v48 = vpack.c.bf16 %v80_v47, %v78_v46  ;;  %v34_v49 = vld [vmem:[%s1188_s0] sm:$0xff]  ;;  %v36_v51 = vld [vmem:[%s1188_s0 + $0x10] sm:$0xff]  ;;  %v37_v52 = vld [vmem:[%s1188_s0 + $0x18] sm:$0xff] }
   0xd   :  { %734 = vmatpush1.bf16.msra.mxu0 %v733_v20  ;;  %v38_v53 = vld [vmem:[%s1188_s0 + $0x20] sm:$0xff]  ;;  %v39_v54 = vld [vmem:[%s1188_s0 + $0x28] sm:$0xff]  ;;  %v40_v55 = vld [vmem:[%s1188_s0 + $0x30] sm:$0xff] }
   0xe   :  { %736 = vmatprep.subr.bf16.mxu0 %v735_v21  ;;  %v41_v56 = vld [vmem:[%s1188_s0 + $0x38] sm:$0xff]  ;;  %v42_v57 = vld [vmem:[%s1188_s0 + $0x40] sm:$0xff]  ;;  %v43_v58 = vld [vmem:[%s1188_s0 + $0x48] sm:$0xff] }
   0xf   :  { %v44_v59 = vld [vmem:[%s1188_s0 + $0x50] sm:$0xff]  ;;  %v45_v60 = vld [vmem:[%s1188_s0 + $0x58] sm:$0xff]  ;;  %v46_v61 = vld [vmem:[%s1188_s0 + $0x60] sm:$0xff] }
  0x10   :  { %v47_v62 = vld [vmem:[%s1188_s0 + $0x68] sm:$0xff]  ;;  %v48_v63 = vld [vmem:[%s1188_s0 + $0x70] sm:$0xff]  ;;  %v49_v0 = vld [vmem:[%s1188_s0 + $0x78] sm:$0xff] }
  0x11   :  { %738 = vmatpush1.bf16.msra.mxu0 %v737_v26  ;;  %v387_v1 = vld [vmem:[%s1189_s2] sm:$0xff]  ;;  %v388_v2 = vld [vmem:[%s1189_s2 + $0x8] sm:$0xff]  ;;  %v390_v5 = vld [vmem:[%s1189_s2 + $0x18] sm:$0xff] }
  0x12   :  { %740 = vmatprep.subr.bf16.mxu0 %v739_v27  ;;  %v755_v4 = vpack.c.bf16 %v388_v2, %v387_v1  ;;  %v391_v7 = vld [vmem:[%s1189_s2 + $0x20] sm:$0xff]  ;;  %v392_v8 = vld [vmem:[%s1189_s2 + $0x28] sm:$0xff]  ;;  %v393_v10 = vld [vmem:[%s1189_s2 + $0x30] sm:$0xff] }
  0x13   :  { %v763_v9 = vpack.c.bf16 %v392_v8, %v391_v7  ;;  %v394_v11 = vld [vmem:[%s1189_s2 + $0x38] sm:$0xff]  ;;  %v395_v13 = vld [vmem:[%s1189_s2 + $0x40] sm:$0xff]  ;;  %v396_v14 = vld [vmem:[%s1189_s2 + $0x48] sm:$0xff] }
  0x14   :  { %756 = vmatprep.subr.bf16.mxu1 %v755_v4  ;;  %v767_v12 = vpack.c.bf16 %v394_v11, %v393_v10  ;;  %v771_v15 = vpack.c.bf16 %v396_v14, %v395_v13  ;;  %v397_v16 = vld [vmem:[%s1189_s2 + $0x50] sm:$0xff]  ;;  %v398_v17 = vld [vmem:[%s1189_s2 + $0x58] sm:$0xff]  ;;  %v399_v19 = vld [vmem:[%s1189_s2 + $0x60] sm:$0xff] }
  0x15   :  { %742 = vmatpush1.bf16.msra.mxu0 %v741_v32  ;;  %758 = vmatpush3.bf16.msra.mxu1 %v755_v4  ;;  %v775_v18 = vpack.c.bf16 %v398_v17, %v397_v16  ;;  %v400_v20 = vld [vmem:[%s1189_s2 + $0x68] sm:$0xff]  ;;  %v401_v22 = vld [vmem:[%s1189_s2 + $0x70] sm:$0xff]  ;;  %v402_v23 = vld [vmem:[%s1189_s2 + $0x78] sm:$0xff] }
  0x16   :  { %744 = vmatprep.subr.bf16.mxu0 %v743_v33  ;;  %v779_v21 = vpack.c.bf16 %v400_v20, %v399_v19  ;;  %v783_v24 = vpack.c.bf16 %v402_v23, %v401_v22 }
  0x19   :  { %746 = vmatpush1.bf16.msra.mxu0 %v745_v38 }
  0x1a   :  { %748 = vmatprep.subr.bf16.mxu0 %v747_v39 }
  0x1d   :  { %750 = vmatpush1.bf16.msra.mxu0 %v749_v44 }
  0x1e   :  { %752 = vmatprep.subr.bf16.mxu0 %v751_v45 }
  0x21   :  { %754 = vmatpush1.bf16.msra.mxu0 %v753_v48 }
  0x24   :  { %147 = vmatmul.mubr.f32.vlgmr.msra.gmra.mrb[0].mxu0 %v34_v49 }
  0x25   :  { %152 = vmatprep.mubr.f32.mxu0 %v852_v3 }
  0x28   :  { %153 = vmatmul.mubr.f32.gmra.mrb[2].mxu0 %v35_v50 }
  0x29   :  { %158 = vmatprep.mubr.f32.mxu0 %v852_v3 }
  0x2c   :  { %159 = vmatmul.mubr.f32.gmra.mrb[4].mxu0 %v36_v51 }
  0x2d   :  { %164 = vmatprep.mubr.f32.mxu0 %v852_v3 }
  0x30   :  { %165 = vmatmul.mubr.f32.gmra.mrb[6].mxu0 %v37_v52 }
  0x31   :  { %170 = vmatprep.mubr.f32.mxu0 %v852_v3 }
  0x34   :  { %171 = vmatmul.mubr.f32.gmra.mrb[8].mxu0 %v38_v53 }
  0x35   :  { %176 = vmatprep.mubr.f32.mxu0 %v852_v3 }
  0x38   :  { %177 = vmatmul.mubr.f32.gmra.mrb[10].mxu0 %v39_v54 }
  0x39   :  { %182 = vmatprep.mubr.f32.mxu0 %v852_v3 }
  0x3c   :  { %183 = vmatmul.mubr.f32.gmra.mrb[12].mxu0 %v40_v55 }
  0x3d   :  { %188 = vmatprep.mubr.f32.mxu0 %v852_v3 }
  0x40   :  { %189 = vmatmul.mubr.f32.gmra.mrb[14].mxu0 %v41_v56 }
  0x41   :  { %194 = vmatprep.mubr.f32.mxu0 %v852_v3 }
  0x44   :  { %195 = vmatmul.mubr.f32.gmra.mrb[16].mxu0 %v42_v57 }
  0x45   :  { %200 = vmatprep.mubr.f32.mxu0 %v852_v3 }
  0x48   :  { %201 = vmatmul.mubr.f32.gmra.mrb[18].mxu0 %v43_v58 }
  0x49   :  { %206 = vmatprep.mubr.f32.mxu0 %v852_v3 }
  0x4c   :  { %207 = vmatmul.mubr.f32.gmra.mrb[20].mxu0 %v44_v59 }
  0x4d   :  { %212 = vmatprep.mubr.f32.mxu0 %v852_v3 }
  0x50   :  { %213 = vmatmul.mubr.f32.gmra.mrb[22].mxu0 %v45_v60 }
  0x51   :  { %218 = vmatprep.mubr.f32.mxu0 %v852_v3 }
  0x54   :  { %219 = vmatmul.mubr.f32.gmra.mrb[24].mxu0 %v46_v61 }
  0x55   :  { %224 = vmatprep.mubr.f32.mxu0 %v852_v3 }
  0x58   :  { %225 = vmatmul.mubr.f32.gmra.mrb[26].mxu0 %v47_v62 }
  0x59   :  { %230 = vmatprep.mubr.f32.mxu0 %v852_v3 }
  0x5c   :  { %231 = vmatmul.mubr.f32.gmra.mrb[28].mxu0 %v48_v63 }
  0x5d   :  { %236 = vmatprep.mubr.f32.mxu0 %v852_v3  ;;  %v389_v3 = vld [vmem:[%s1189_s2 + $0x10] sm:$0xff] }
  0x5e   :  { %v759_v6 = vpack.c.bf16 %v390_v5, %v389_v3 }
  0x60   :  { %237 = vmatmul.mubr.f32.gmra.mrb[30].mxu0 %v49_v0  ;;  %760 = vmatprep.subr.bf16.mxu1 %v759_v6 }
  0x61   :  { %762 = vmatpush3.bf16.msra.mxu1 %v759_v6 }
  0x62   :  { %764 = vmatprep.subr.bf16.mxu1 %v763_v9 }
  0x65   :  { %766 = vmatpush3.bf16.msra.mxu1 %v763_v9 }
  0x66   :  { %768 = vmatprep.subr.bf16.mxu1 %v767_v12 }
  0x69   :  { %770 = vmatpush3.bf16.msra.mxu1 %v767_v12 }
  0x6a   :  { %772 = vmatprep.subr.bf16.mxu1 %v771_v15 }
  0x6d   :  { %774 = vmatpush3.bf16.msra.mxu1 %v771_v15 }
  0x6e   :  { %776 = vmatprep.subr.bf16.mxu1 %v775_v18 }
  0x71   :  { %778 = vmatpush3.bf16.msra.mxu1 %v775_v18 }
  0x72   :  { %780 = vmatprep.subr.bf16.mxu1 %v779_v21 }
  0x75   :  { %782 = vmatpush3.bf16.msra.mxu1 %v779_v21 }
  0x76   :  { %784 = vmatprep.subr.bf16.mxu1 %v783_v24 }
  0x79   :  { %786 = vmatpush3.bf16.msra.mxu1 %v783_v24 }
  0xf7   :  { %v148_v25 = vpop.f32.mrb[0].mxu0 }
  0xf8   :  { %v150_v26 = vpop.f32.mrb[1].mxu0 }
  0xf9   :  { %v619_v27 = vmul.f32 -1.442695, %v150_v26 }
  0xfb   :  { %788 = vpow2.f32 %v619_v27  ;;  %v154_v28 = vpop.f32.mrb[2].mxu0 }
  0xfc   :  { %v156_v29 = vpop.f32.mrb[3].mxu0 }
  0xfd   :  { %v620_v30 = vmul.f32 -1.442695, %v156_v29 }
  0xff   :  { %790 = vpow2.f32 %v620_v30  ;;  %v160_v31 = vpop.f32.mrb[4].mxu0 }
 0x100   :  { %v162_v32 = vpop.f32.mrb[5].mxu0 }
 0x101   :  { %v621_v33 = vmul.f32 -1.442695, %v162_v32 }
 0x103   :  { %792 = vpow2.f32 %v621_v33  ;;  %v1081_v34 = vpop.f32.mrb[6].mxu0 }
 0x104   :  { %v168_v35 = vpop.f32.mrb[7].mxu0 }
 0x105   :  { %v789_v36 = vpop.eup %788  ;;  %v622_v37 = vmul.f32 -1.442695, %v168_v35 }
 0x106   :  { %v291_v38 = vadd.f32 1.0, %v789_v36 }
 0x107   :  { %794 = vpow2.f32 %v622_v37  ;;  %v1083_v39 = vpop.f32.mrb[8].mxu0 }
 0x108   :  { %796 = vrcp.f32 %v291_v38  ;;  %v174_v40 = vpop.f32.mrb[9].mxu0 }
 0x109   :  { %v791_v41 = vpop.eup %790  ;;  %v623_v42 = vmul.f32 -1.442695, %v174_v40 }
 0x10a   :  { %v292_v43 = vadd.f32 1.0, %v791_v41 }
 0x10b   :  { %798 = vpow2.f32 %v623_v42  ;;  %v1085_v44 = vpop.f32.mrb[10].mxu0 }
 0x10c   :  { %800 = vrcp.f32 %v292_v43  ;;  %v1087_v45 = vpop.f32.mrb[11].mxu0 }
 0x10d   :  { %v793_v46 = vpop.eup %792  ;;  %v624_v47 = vmul.f32 -1.442695, %v1087_v45 }
 0x10e   :  { %v293_v48 = vadd.f32 1.0, %v793_v46 }
 0x10f   :  { %802 = vpow2.f32 %v624_v47  ;;  %v1090_v49 = vpop.f32.mrb[12].mxu0 }
 0x110   :  { %804 = vrcp.f32 %v293_v48  ;;  %v1092_v50 = vpop.f32.mrb[13].mxu0 }
 0x111   :  { %v795_v51 = vpop.eup %794  ;;  %v625_v52 = vmul.f32 -1.442695, %v1092_v50 }
 0x112   :  { %v797_v53 = vpop.eup %796  ;;  %v294_v54 = vadd.f32 1.0, %v795_v51 }
 0x113   :  { %v339_v55 = vmul.f32 %v797_v53, %v150_v26  ;;  %806 = vpow2.f32 %v625_v52  ;;  %v1095_v56 = vpop.f32.mrb[14].mxu0 }
 0x114   :  { %808 = vrcp.f32 %v294_v54  ;;  %v1097_v57 = vpop.f32.mrb[15].mxu0 }
 0x115   :  { %v799_v58 = vpop.eup %798  ;;  %v626_v59 = vmul.f32 -1.442695, %v1097_v57  ;;  %v355_v60 = vmul.f32 %v339_v55, %v148_v25 }
 0x116   :  { %v801_v61 = vpop.eup %800  ;;  %v295_v62 = vadd.f32 1.0, %v799_v58 }
 0x117   :  { %v340_v63 = vmul.f32 %v801_v61, %v156_v29  ;;  %810 = vpow2.f32 %v626_v59  ;;  %v1100_v0 = vpop.f32.mrb[16].mxu0  ;;  %699 = vmatprep.mubr.f32.mxu1 %v355_v60 }
 0x118   :  { %812 = vrcp.f32 %v295_v62  ;;  %v1102_v1 = vpop.f32.mrb[17].mxu0 }
 0x119   :  { %v803_v2 = vpop.eup %802  ;;  %v356_v4 = vmul.f32 %v340_v63, %v154_v28  ;;  %v627_v3 = vmul.f32 -1.442695, %v1102_v1 }
 0x11a   :  { %v805_v5 = vpop.eup %804  ;;  %v296_v6 = vadd.f32 1.0, %v803_v2 }
 0x11b   :  { %v341_v7 = vmul.f32 %v805_v5, %v162_v32  ;;  %814 = vpow2.f32 %v627_v3  ;;  %v1105_v8 = vpop.f32.mrb[18].mxu0  ;;  %700 = vmatmul.mubr.f32.vlgmr.msra.gmra.mrb[0].mxu1 %v356_v4 }
 0x11c   :  { %816 = vrcp.f32 %v296_v6  ;;  %v1107_v9 = vpop.f32.mrb[19].mxu0 }
 0x11d   :  { %v807_v10 = vpop.eup %806  ;;  %v357_v11 = vmul.f32 %v341_v7, %v160_v31  ;;  %v628_v12 = vmul.f32 -1.442695, %v1107_v9 }
 0x11e   :  { %v809_v13 = vpop.eup %808  ;;  %v297_v14 = vadd.f32 1.0, %v807_v10 }
 0x11f   :  { %v342_v15 = vmul.f32 %v809_v13, %v168_v35  ;;  %818 = vpow2.f32 %v628_v12  ;;  %v1110_v16 = vpop.f32.mrb[20].mxu0  ;;  %702 = vmatprep.mubr.f32.mxu1 %v357_v11 }
 0x120   :  { %820 = vrcp.f32 %v297_v14  ;;  %v1112_v17 = vpop.f32.mrb[21].mxu0 }
 0x121   :  { %v811_v18 = vpop.eup %810  ;;  %v358_v19 = vmul.f32 %v342_v15, %v1081_v34  ;;  %v629_v20 = vmul.f32 -1.442695, %v1112_v17 }
 0x122   :  { %v813_v21 = vpop.eup %812  ;;  %v298_v22 = vadd.f32 1.0, %v811_v18 }
 0x123   :  { %v343_v23 = vmul.f32 %v813_v21, %v174_v40  ;;  %822 = vpow2.f32 %v629_v20  ;;  %v1116_v24 = vpop.f32.mrb[22].mxu0  ;;  %703 = vmatmul.mubr.f32.gmra.mrb[2].mxu1 %v358_v19 }
 0x124   :  { %824 = vrcp.f32 %v298_v22  ;;  %v1118_v25 = vpop.f32.mrb[23].mxu0 }
 0x125   :  { %v815_v26 = vpop.eup %814  ;;  %v359_v27 = vmul.f32 %v343_v23, %v1083_v39  ;;  %v630_v28 = vmul.f32 -1.442695, %v1118_v25 }
 0x126   :  { %v817_v29 = vpop.eup %816  ;;  %v299_v30 = vadd.f32 1.0, %v815_v26 }
 0x127   :  { %v344_v31 = vmul.f32 %v817_v29, %v1087_v45  ;;  %826 = vpow2.f32 %v630_v28  ;;  %v1123_v32 = vpop.f32.mrb[24].mxu0  ;;  %705 = vmatprep.mubr.f32.mxu1 %v359_v27 }
 0x128   :  { %828 = vrcp.f32 %v299_v30  ;;  %v222_v33 = vpop.f32.mrb[25].mxu0 }
 0x129   :  { %v819_v34 = vpop.eup %818  ;;  %v360_v35 = vmul.f32 %v344_v31, %v1085_v44  ;;  %v631_v36 = vmul.f32 -1.442695, %v222_v33 }
 0x12a   :  { %v821_v37 = vpop.eup %820  ;;  %v300_v38 = vadd.f32 1.0, %v819_v34 }
 0x12b   :  { %v345_v39 = vmul.f32 %v821_v37, %v1092_v50  ;;  %830 = vpow2.f32 %v631_v36  ;;  %v226_v40 = vpop.f32.mrb[26].mxu0  ;;  %706 = vmatmul.mubr.f32.gmra.mrb[4].mxu1 %v360_v35 }
 0x12c   :  { %832 = vrcp.f32 %v300_v38  ;;  %v228_v41 = vpop.f32.mrb[27].mxu0 }
 0x12d   :  { %v823_v42 = vpop.eup %822  ;;  %v361_v43 = vmul.f32 %v345_v39, %v1090_v49  ;;  %v632_v45 = vmul.f32 -1.442695, %v228_v41 }
 0x12e   :  { %v825_v46 = vpop.eup %824  ;;  %v301_v47 = vadd.f32 1.0, %v823_v42 }
 0x12f   :  { %v346_v48 = vmul.f32 %v825_v46, %v1097_v57  ;;  %834 = vpow2.f32 %v632_v45  ;;  %v232_v44 = vpop.f32.mrb[28].mxu0  ;;  %708 = vmatprep.mubr.f32.mxu1 %v361_v43 }
 0x130   :  { %836 = vrcp.f32 %v301_v47  ;;  %v234_v51 = vpop.f32.mrb[29].mxu0 }
 0x131   :  { %v827_v52 = vpop.eup %826  ;;  %v362_v50 = vmul.f32 %v346_v48, %v1095_v56  ;;  %v633_v53 = vmul.f32 -1.442695, %v234_v51 }
 0x132   :  { %v829_v54 = vpop.eup %828  ;;  %v302_v55 = vadd.f32 1.0, %v827_v52 }
 0x133   :  { %v347_v58 = vmul.f32 %v829_v54, %v1102_v1  ;;  %838 = vpow2.f32 %v633_v53  ;;  %v238_v49 = vpop.f32.mrb[30].mxu0  ;;  %709 = vmatmul.mubr.f32.gmra.mrb[6].mxu1 %v362_v50 }
 0x134   :  { %840 = vrcp.f32 %v302_v55  ;;  %v240_v59 = vpop.f32.mrb[31].mxu0 }
 0x135   :  { %v831_v60 = vpop.eup %830  ;;  %v363_v57 = vmul.f32 %v347_v58, %v1100_v0  ;;  %v634_v61 = vmul.f32 -1.442695, %v240_v59 }
 0x136   :  { %v833_v62 = vpop.eup %832  ;;  %v303_v63 = vadd.f32 1.0, %v831_v60 }
 0x137   :  { %v348_v2 = vmul.f32 %v833_v62, %v1107_v9  ;;  %842 = vpow2.f32 %v634_v61  ;;  %711 = vmatprep.mubr.f32.mxu1 %v363_v57 }
 0x138   :  { %844 = vrcp.f32 %v303_v63 }
 0x139   :  { %v835_v56 = vpop.eup %834  ;;  %v364_v4 = vmul.f32 %v348_v2, %v1105_v8 }
 0x13a   :  { %v837_v1 = vpop.eup %836  ;;  %v304_v3 = vadd.f32 1.0, %v835_v56 }
 0x13b   :  { %v349_v5 = vmul.f32 %v837_v1, %v1112_v17  ;;  %712 = vmatmul.mubr.f32.gmra.mrb[8].mxu1 %v364_v4 }
 0x13c   :  { %846 = vrcp.f32 %v304_v3 }
 0x13d   :  { %v839_v6 = vpop.eup %838  ;;  %v365_v0 = vmul.f32 %v349_v5, %v1110_v16 }
 0x13e   :  { %v841_v7 = vpop.eup %840  ;;  %v305_v10 = vadd.f32 1.0, %v839_v6 }
 0x13f   :  { %v350_v11 = vmul.f32 %v841_v7, %v1118_v25  ;;  %714 = vmatprep.mubr.f32.mxu1 %v365_v0 }
 0x140   :  { %848 = vrcp.f32 %v305_v10 }
 0x141   :  { %v843_v9 = vpop.eup %842  ;;  %v366_v12 = vmul.f32 %v350_v11, %v1116_v24 }
 0x142   :  { %v845_v13 = vpop.eup %844  ;;  %v306_v8 = vadd.f32 1.0, %v843_v9 }
 0x143   :  { %v351_v14 = vmul.f32 %v845_v13, %v222_v33  ;;  %715 = vmatmul.mubr.f32.gmra.mrb[10].mxu1 %v366_v12 }
 0x144   :  { %850 = vrcp.f32 %v306_v8 }
 0x145   :  { %v367_v15 = vmul.f32 %v351_v14, %v1123_v32 }
 0x146   :  { %v847_v17 = vpop.eup %846 }
 0x147   :  { %v352_v18 = vmul.f32 %v847_v17, %v228_v41  ;;  %717 = vmatprep.mubr.f32.mxu1 %v367_v15 }
 0x149   :  { %v368_v16 = vmul.f32 %v352_v18, %v226_v40 }
 0x14a   :  { %v849_v19 = vpop.eup %848 }
 0x14b   :  { %v353_v20 = vmul.f32 %v849_v19, %v234_v51  ;;  %718 = vmatmul.mubr.f32.gmra.mrb[12].mxu1 %v368_v16 }
 0x14d   :  { %v369_v21 = vmul.f32 %v353_v20, %v232_v44 }
 0x14e   :  { %v851_v22 = vpop.eup %850 }
 0x14f   :  { %v354_v23 = vmul.f32 %v851_v22, %v240_v59  ;;  %720 = vmatprep.mubr.f32.mxu1 %v369_v21 }
 0x151   :  { %v370_v25 = vmul.f32 %v354_v23, %v238_v49 }
 0x153   :  { %721 = vmatmul.mubr.f32.gmra.mrb[14].mxu1 %v370_v25 }
 0x1ee   :  { %v701_v24 = vpop.f32.mrb[0].mxu1 }
 0x1ef   :  { %600 = vst [vmem:[%s1190_s3 + $0x8] sm:$0xff] %v701_v24  ;;  %v469_v26 = vpop.f32.mrb[1].mxu1 }
 0x1f0   :  { %599 = vst [vmem:[%s1190_s3] sm:$0xff] %v469_v26 }
 0x1f6   :  { %v704_v27 = vpop.f32.mrb[2].mxu1 }
 0x1f7   :  { %602 = vst [vmem:[%s1190_s3 + $0x18] sm:$0xff] %v704_v27  ;;  %v479_v28 = vpop.f32.mrb[3].mxu1 }
 0x1f8   :  { %601 = vst [vmem:[%s1190_s3 + $0x10] sm:$0xff] %v479_v28 }
 0x1fe   :  { %v707_v29 = vpop.f32.mrb[4].mxu1 }
 0x1ff   :  { %604 = vst [vmem:[%s1190_s3 + $0x28] sm:$0xff] %v707_v29  ;;  %v489_v30 = vpop.f32.mrb[5].mxu1 }
 0x200   :  { %603 = vst [vmem:[%s1190_s3 + $0x20] sm:$0xff] %v489_v30 }
 0x206   :  { %v710_v31 = vpop.f32.mrb[6].mxu1 }
 0x207   :  { %606 = vst [vmem:[%s1190_s3 + $0x38] sm:$0xff] %v710_v31  ;;  %v499_v32 = vpop.f32.mrb[7].mxu1 }
 0x208   :  { %605 = vst [vmem:[%s1190_s3 + $0x30] sm:$0xff] %v499_v32 }
 0x20e   :  { %v713_v33 = vpop.f32.mrb[8].mxu1 }
 0x20f   :  { %608 = vst [vmem:[%s1190_s3 + $0x48] sm:$0xff] %v713_v33  ;;  %v509_v34 = vpop.f32.mrb[9].mxu1 }
 0x210   :  { %607 = vst [vmem:[%s1190_s3 + $0x40] sm:$0xff] %v509_v34 }
 0x216   :  { %v716_v35 = vpop.f32.mrb[10].mxu1 }
 0x217   :  { %610 = vst [vmem:[%s1190_s3 + $0x58] sm:$0xff] %v716_v35  ;;  %v519_v36 = vpop.f32.mrb[11].mxu1 }
 0x218   :  { %609 = vst [vmem:[%s1190_s3 + $0x50] sm:$0xff] %v519_v36 }
 0x21e   :  { %v719_v37 = vpop.f32.mrb[12].mxu1 }
 0x21f   :  { %612 = vst [vmem:[%s1190_s3 + $0x68] sm:$0xff] %v719_v37  ;;  %v529_v38 = vpop.f32.mrb[13].mxu1 }
 0x220   :  { %611 = vst [vmem:[%s1190_s3 + $0x60] sm:$0xff] %v529_v38 }
 0x226   :  { %v722_v39 = vpop.f32.mrb[14].mxu1 }
 0x227   :  { %614 = vst [vmem:[%s1190_s3 + $0x78] sm:$0xff] %v722_v39  ;;  %v539_v40 = vpop.f32.mrb[15].mxu1 }
 0x228   :  { %613 = vst [vmem:[%s1190_s3 + $0x70] sm:$0xff] %v539_v40 }

</bundles_post_ra>
